<compile_context>
chip_gen: v5e
topology: v5e:2x2
jax: 0.10.0
libtpu: 0.0.40
codegen_flags: <defaults>
</compile_context>

<pallas_src>
import jax
import jax.numpy as jnp
from jax import lax
from jax.experimental import pallas as pl
from jax.experimental.pallas import tpu as pltpu

CLASSES = 18
EPS = 1e-7
_LANES = 128


def _round_up(x, m):
    return ((x + m - 1) // m) * m


def _make_kernel(pad_count):
    # pad_count is a static Python int (known from shapes), baked into the
    # kernel closure; padded logits MUST be exact zeros (see wrapper).
    pad_corr = float(pad_count) / float(CLASSES)

    def kernel(yp_ref, yt_ref, out_ref, tp_ref, sp_ref, cnt_ref):
        b = pl.program_id(0)

        @pl.when(b == 0)
        def _init():
            tp_ref[...] = jnp.zeros_like(tp_ref)
            sp_ref[...] = jnp.zeros_like(sp_ref)
            cnt_ref[...] = jnp.zeros_like(cnt_ref)

        c, bt = yp_ref.shape  # (C, bt): classes on sublanes, batch on lanes

        # --- softmax over the class (sublane) axis; dim=1 of the original ---
        logits = yp_ref[...].astype(jnp.float32)            # (C, bt)
        m = jnp.max(logits, axis=0, keepdims=True)          # (1, bt)
        e = jnp.exp(logits - m)                              # (C, bt)
        denom = jnp.sum(e, axis=0, keepdims=True)            # (1, bt)
        inv = 1.0 / denom                                     # narrow exact divide
        p = e * inv                                           # (C, bt) probs

        # --- one-hot(y_true, C) via sublane-iota compare (padded cols: -1) ---
        labels = yt_ref[...]                                  # (1, bt) int32
        cls_idx = lax.broadcasted_iota(jnp.int32, (c, bt), 0)
        y1h = (cls_idx == labels).astype(jnp.float32)         # (C, bt)

        # --- lane-dense accumulation: pure VPU adds, no reductions here ---
        tp_ref[...] += y1h * p
        sp_ref[...] += p
        cnt_ref[...] += y1h

        @pl.when(b == pl.num_programs(0) - 1)
        def _finalize():
            # single lane reduction (bt -> 1), done once per kernel
            tp = jnp.sum(tp_ref[...], axis=1, keepdims=True)      # (C, 1)
            sum_p = jnp.sum(sp_ref[...], axis=1, keepdims=True)   # (C, 1)
            cnt = jnp.sum(cnt_ref[...], axis=1, keepdims=True)    # (C, 1)
            if pad_count:
                # each zero-logit padded column contributes exactly 1/C to
                # every class of sum_p and nothing to tp / cnt
                sum_p = sum_p - pad_corr
            fp = sum_p - tp
            fn = cnt - tp
            precision = tp / (tp + fp + EPS)
            recall = tp / (tp + fn + EPS)
            f1 = 2.0 * (precision * recall) / (precision + recall + EPS)
            f1 = jnp.clip(f1, EPS, 1.0 - EPS)
            f1_mean = jnp.mean(f1)
            out_ref[0] = 1.0 - f1_mean
            out_ref[1] = f1_mean

    return kernel


def f1_loss(y_pred, y_true, *, lanes_tile=2048):
    N, C = y_pred.shape
    assert C == CLASSES
    assert lanes_tile % _LANES == 0

    # For small N use a single grid step; otherwise stream 2048-lane tiles.
    bt = min(lanes_tile, _round_up(N, _LANES))
    n_pad = _round_up(N, bt)
    pad = n_pad - N

    # Lane-dense layout: classes on sublanes, batch on lanes.
    yp_t = jnp.transpose(y_pred).astype(jnp.float32)       # (C, N)
    yt = y_true.reshape(1, N).astype(jnp.int32)             # (1, N)
    if pad:
        yp_t = jnp.pad(yp_t, ((0, 0), (0, pad)))            # exact zeros (required
        #   invariant for the analytic pad correction in the kernel finalize)
        yt = jnp.pad(yt, ((0, 0), (0, pad)), constant_values=-1)

    out = pl.pallas_call(
        _make_kernel(pad),
        out_shape=jax.ShapeDtypeStruct((2,), jnp.float32),
        grid_spec=pltpu.PrefetchScalarGridSpec(
            num_scalar_prefetch=0,
            grid=(n_pad // bt,),
            in_specs=[
                pl.BlockSpec((C, bt), lambda i: (0, i)),
                pl.BlockSpec((1, bt), lambda i: (0, i)),
            ],
            out_specs=pl.BlockSpec(memory_space=pltpu.SMEM),
            scratch_shapes=[
                pltpu.VMEM((C, bt), jnp.float32),  # tp partials
                pltpu.VMEM((C, bt), jnp.float32),  # softmax-mass partials
                pltpu.VMEM((C, bt), jnp.float32),  # label-count partials
            ],
        ),
        compiler_params=pltpu.CompilerParams(
            dimension_semantics=("arbitrary",),  # batch axis carries accumulators
        ),
    )(yp_t, yt)
    # TODO(synk): on v7x, shard the batch/lane axis across the 2 TensorCores
    # (leading "parallel" axis + per-core accumulators + cross-core combine)
    # for very large N; unnecessary at these sizes.
    return out[0], out[1]


def f1_loss_ref(y_pred, y_true):
    # pure-JAX reference mirroring the PyTorch module
    y1h = jax.nn.one_hot(y_true, CLASSES, dtype=jnp.float32)
    p = jax.nn.softmax(y_pred.astype(jnp.float32), axis=1)
    tp = (y1h * p).sum(axis=0)
    fp = ((1 - y1h) * p).sum(axis=0)
    fn = (y1h * (1 - p)).sum(axis=0)
    precision = tp / (tp + fp + EPS)
    recall = tp / (tp + fn + EPS)
    f1 = 2 * (precision * recall) / (precision + recall + EPS)
    f1 = jnp.clip(f1, EPS, 1 - EPS)
    return 1 - f1.mean(), f1.mean()


if __name__ == "__main__":
    key = jax.random.PRNGKey(0)
    k1, k2, k3, k4 = jax.random.split(key, 4)

    # Case 1: small batch -> one 128-lane tile, single grid step, 64 padded cols.
    N = 64
    y_pred = jax.random.normal(k1, (N, CLASSES), dtype=jnp.float32)
    y_true = jax.random.randint(k2, (N,), 0, CLASSES, dtype=jnp.int32)
    loss, f1m = f1_loss(y_pred, y_true)
    loss, f1m = jax.block_until_ready((loss, f1m))
    ref_loss, ref_f1m = f1_loss_ref(y_pred, y_true)
    assert jnp.allclose(loss, ref_loss, atol=1e-5, rtol=1e-5), (loss, ref_loss)
    assert jnp.allclose(f1m, ref_f1m, atol=1e-5, rtol=1e-5), (f1m, ref_f1m)

    # Case 2: batch not divisible by the tile -> multi-step accumulator path
    # plus the analytic padded-column correction.
    N2 = 300
    y_pred2 = jax.random.normal(k3, (N2, CLASSES), dtype=jnp.float32)
    y_true2 = jax.random.randint(k4, (N2,), 0, CLASSES, dtype=jnp.int32)
    loss2, f1m2 = f1_loss(y_pred2, y_true2, lanes_tile=128)
    loss2, f1m2 = jax.block_until_ready((loss2, f1m2))
    ref_loss2, ref_f1m2 = f1_loss_ref(y_pred2, y_true2)
    assert jnp.allclose(loss2, ref_loss2, atol=1e-5, rtol=1e-5), (loss2, ref_loss2)
    assert jnp.allclose(f1m2, ref_f1m2, atol=1e-5, rtol=1e-5), (f1m2, ref_f1m2)

    print("KERNEL_OK")
</pallas_src>

<mosaic_0001>
module attributes {stable_mosaic.version = 11 : i64} {
  func.func @kernel(%arg0: i32, %arg1: memref<18x128xf32, #tpu.memory_space<vmem>>, %arg2: memref<1x128xi32, #tpu.memory_space<vmem>>, %arg3: memref<2xf32, #tpu.memory_space<smem>>, %arg4: memref<18x128xf32, #tpu.memory_space<vmem>>, %arg5: memref<18x128xf32, #tpu.memory_space<vmem>>, %arg6: memref<18x128xf32, #tpu.memory_space<vmem>>) attributes {dimension_semantics = [#tpu.dimension_semantics<arbitrary>], iteration_bounds = array<i64: 1>, scalar_prefetch = 0 : i64, scratch_operands = 3 : i64, tpu.core_type = #tpu.core_type<tc>, window_params = [{transform_indices = @transform_0, window_bounds = array<i64: 18, 128>}, {transform_indices = @transform_1, window_bounds = array<i64: 1, 128>}, {transform_indices = @transform_2, window_bounds = array<i64: 2>}]} {
    %c0_i32 = arith.constant 0 : i32
    %0 = arith.cmpi eq, %arg0, %c0_i32 : i32
    %1 = arith.extui %0 : i1 to i32
    %c0_i32_0 = arith.constant 0 : i32
    %2 = arith.cmpi ne, %1, %c0_i32_0 : i32
    scf.if %2 {
      %cst_20 = arith.constant 0.000000e+00 : f32
      %34 = vector.broadcast %cst_20 : f32 to vector<18x128xf32>
      %c0_21 = arith.constant 0 : index
      %c0_22 = arith.constant 0 : index
      %35 = vector.load %arg4[%c0_21, %c0_22] : memref<18x128xf32, #tpu.memory_space<vmem>>, vector<18x128xf32>
      tpu.vector_store %arg4[%c0_21, %c0_22], %34 {strides = array<i32>} : memref<18x128xf32, #tpu.memory_space<vmem>>, vector<18x128xf32>,
      %cst_23 = arith.constant 0.000000e+00 : f32
      %36 = vector.broadcast %cst_23 : f32 to vector<18x128xf32>
      %c0_24 = arith.constant 0 : index
      %c0_25 = arith.constant 0 : index
      %37 = vector.load %arg5[%c0_24, %c0_25] : memref<18x128xf32, #tpu.memory_space<vmem>>, vector<18x128xf32>
      tpu.vector_store %arg5[%c0_24, %c0_25], %36 {strides = array<i32>} : memref<18x128xf32, #tpu.memory_space<vmem>>, vector<18x128xf32>,
      %cst_26 = arith.constant 0.000000e+00 : f32
      %38 = vector.broadcast %cst_26 : f32 to vector<18x128xf32>
      %c0_27 = arith.constant 0 : index
      %c0_28 = arith.constant 0 : index
      %39 = vector.load %arg6[%c0_27, %c0_28] : memref<18x128xf32, #tpu.memory_space<vmem>>, vector<18x128xf32>
      tpu.vector_store %arg6[%c0_27, %c0_28], %38 {strides = array<i32>} : memref<18x128xf32, #tpu.memory_space<vmem>>, vector<18x128xf32>,
    } else {
    }
    %c0 = arith.constant 0 : index
    %c0_1 = arith.constant 0 : index
    %3 = vector.load %arg1[%c0, %c0_1] : memref<18x128xf32, #tpu.memory_space<vmem>>, vector<18x128xf32>
    %cst = arith.constant dense<0xFF800000> : vector<128xf32>
    %4 = vector.multi_reduction <maximumf>, %3, %cst [0] : vector<18x128xf32> to vector<128xf32>
    %5 = vector.shape_cast %4 : vector<128xf32> to vector<1x128xf32>
    %6 = vector.broadcast %5 : vector<1x128xf32> to vector<18x128xf32>
    %7 = arith.subf %3, %6 : vector<18x128xf32>
    %8 = math.exp %7 : vector<18x128xf32>
    %cst_2 = arith.constant dense<0.000000e+00> : vector<128xf32>
    %9 = vector.multi_reduction <add>, %8, %cst_2 [0] : vector<18x128xf32> to vector<128xf32>
    %10 = vector.shape_cast %9 : vector<128xf32> to vector<1x128xf32>
    %cst_3 = arith.constant 1.000000e+00 : f32
    %11 = vector.broadcast %cst_3 : f32 to vector<1x128xf32>
    %12 = arith.divf %11, %10 : vector<1x128xf32>
    %13 = vector.broadcast %12 : vector<1x128xf32> to vector<18x128xf32>
    %14 = arith.mulf %8, %13 : vector<18x128xf32>
    %c0_4 = arith.constant 0 : index
    %c0_5 = arith.constant 0 : index
    %15 = vector.load %arg2[%c0_4, %c0_5] : memref<1x128xi32, #tpu.memory_space<vmem>>, vector<1x128xi32>
    %16 = tpu.iota {dimensions = array<i32: 0>} : vector<18x128xi32>
    %17 = vector.broadcast %15 : vector<1x128xi32> to vector<18x128xi32>
    %18 = arith.cmpi eq, %16, %17 : vector<18x128xi32>
    %19 = arith.extui %18 : vector<18x128xi1> to vector<18x128xi32>
    %20 = arith.sitofp %19 : vector<18x128xi32> to vector<18x128xf32>
    %c0_6 = arith.constant 0 : index
    %c0_7 = arith.constant 0 : index
    %21 = vector.load %arg4[%c0_6, %c0_7] : memref<18x128xf32, #tpu.memory_space<vmem>>, vector<18x128xf32>
    %22 = arith.mulf %20, %14 : vector<18x128xf32>
    %23 = arith.addf %21, %22 : vector<18x128xf32>
    %c0_8 = arith.constant 0 : index
    %c0_9 = arith.constant 0 : index
    %24 = vector.load %arg4[%c0_8, %c0_9] : memref<18x128xf32, #tpu.memory_space<vmem>>, vector<18x128xf32>
    tpu.vector_store %arg4[%c0_8, %c0_9], %23 {strides = array<i32>} : memref<18x128xf32, #tpu.memory_space<vmem>>, vector<18x128xf32>,
    %c0_10 = arith.constant 0 : index
    %c0_11 = arith.constant 0 : index
    %25 = vector.load %arg5[%c0_10, %c0_11] : memref<18x128xf32, #tpu.memory_space<vmem>>, vector<18x128xf32>
    %26 = arith.addf %25, %14 : vector<18x128xf32>
    %c0_12 = arith.constant 0 : index
    %c0_13 = arith.constant 0 : index
    %27 = vector.load %arg5[%c0_12, %c0_13] : memref<18x128xf32, #tpu.memory_space<vmem>>, vector<18x128xf32>
    tpu.vector_store %arg5[%c0_12, %c0_13], %26 {strides = array<i32>} : memref<18x128xf32, #tpu.memory_space<vmem>>, vector<18x128xf32>,
    %c0_14 = arith.constant 0 : index
    %c0_15 = arith.constant 0 : index
    %28 = vector.load %arg6[%c0_14, %c0_15] : memref<18x128xf32, #tpu.memory_space<vmem>>, vector<18x128xf32>
    %29 = arith.addf %28, %20 : vector<18x128xf32>
    %c0_16 = arith.constant 0 : index
    %c0_17 = arith.constant 0 : index
    %30 = vector.load %arg6[%c0_16, %c0_17] : memref<18x128xf32, #tpu.memory_space<vmem>>, vector<18x128xf32>
    tpu.vector_store %arg6[%c0_16, %c0_17], %29 {strides = array<i32>} : memref<18x128xf32, #tpu.memory_space<vmem>>, vector<18x128xf32>,
    %c0_i32_18 = arith.constant 0 : i32
    %31 = arith.cmpi eq, %arg0, %c0_i32_18 : i32
    %32 = arith.extui %31 : i1 to i32
    %c0_i32_19 = arith.constant 0 : i32
    %33 = arith.cmpi ne, %32, %c0_i32_19 : i32
    scf.if %33 {
      %c0_20 = arith.constant 0 : index
      %c0_21 = arith.constant 0 : index
      %34 = vector.load %arg4[%c0_20, %c0_21] : memref<18x128xf32, #tpu.memory_space<vmem>>, vector<18x128xf32>
      %cst_22 = arith.constant dense<0.000000e+00> : vector<18xf32>
      %35 = vector.multi_reduction <add>, %34, %cst_22 [1] : vector<18x128xf32> to vector<18xf32>
      %36 = vector.shape_cast %35 : vector<18xf32> to vector<18x1xf32>
      %c0_23 = arith.constant 0 : index
      %c0_24 = arith.constant 0 : index
      %37 = vector.load %arg5[%c0_23, %c0_24] : memref<18x128xf32, #tpu.memory_space<vmem>>, vector<18x128xf32>
      %cst_25 = arith.constant dense<0.000000e+00> : vector<18xf32>
      %38 = vector.multi_reduction <add>, %37, %cst_25 [1] : vector<18x128xf32> to vector<18xf32>
      %39 = vector.shape_cast %38 : vector<18xf32> to vector<18x1xf32>
      %c0_26 = arith.constant 0 : index
      %c0_27 = arith.constant 0 : index
      %40 = vector.load %arg6[%c0_26, %c0_27] : memref<18x128xf32, #tpu.memory_space<vmem>>, vector<18x128xf32>
      %cst_28 = arith.constant dense<0.000000e+00> : vector<18xf32>
      %41 = vector.multi_reduction <add>, %40, %cst_28 [1] : vector<18x128xf32> to vector<18xf32>
      %42 = vector.shape_cast %41 : vector<18xf32> to vector<18x1xf32>
      %cst_29 = arith.constant 3.55555558 : f32
      %43 = vector.broadcast %cst_29 : f32 to vector<18x1xf32>
      %44 = arith.subf %39, %43 : vector<18x1xf32>
      %45 = arith.subf %44, %36 : vector<18x1xf32>
      %46 = arith.subf %42, %36 : vector<18x1xf32>
      %47 = arith.addf %36, %45 : vector<18x1xf32>
      %cst_30 = arith.constant 1.000000e-07 : f32
      %48 = vector.broadcast %cst_30 : f32 to vector<18x1xf32>
      %49 = arith.addf %47, %48 : vector<18x1xf32>
      %50 = arith.divf %36, %49 : vector<18x1xf32>
      %51 = arith.addf %36, %46 : vector<18x1xf32>
      %cst_31 = arith.constant 1.000000e-07 : f32
      %52 = vector.broadcast %cst_31 : f32 to vector<18x1xf32>
      %53 = arith.addf %51, %52 : vector<18x1xf32>
      %54 = arith.divf %36, %53 : vector<18x1xf32>
      %55 = arith.mulf %50, %54 : vector<18x1xf32>
      %cst_32 = arith.constant 2.000000e+00 : f32
      %56 = vector.broadcast %cst_32 : f32 to vector<18x1xf32>
      %57 = arith.mulf %56, %55 : vector<18x1xf32>
      %58 = arith.addf %50, %54 : vector<18x1xf32>
      %cst_33 = arith.constant 1.000000e-07 : f32
      %59 = vector.broadcast %cst_33 : f32 to vector<18x1xf32>
      %60 = arith.addf %58, %59 : vector<18x1xf32>
      %61 = arith.divf %57, %60 : vector<18x1xf32>
      %cst_34 = arith.constant 1.000000e-07 : f32
      %cst_35 = arith.constant 0.99999988 : f32
      %62 = vector.broadcast %cst_34 : f32 to vector<18x1xf32>
      %63 = arith.maximumf %62, %61 : vector<18x1xf32>
      %64 = vector.broadcast %cst_35 : f32 to vector<18x1xf32>
      %65 = arith.minimumf %64, %63 : vector<18x1xf32>
      %66 = vector.shape_cast %65 : vector<18x1xf32> to vector<1x18x1xf32>
      %cst_36 = arith.constant dense<0.000000e+00> : vector<1xf32>
      %67 = vector.multi_reduction <add>, %66, %cst_36 [1, 2] : vector<1x18x1xf32> to vector<1xf32>
      %68 = vector.shape_cast %67 : vector<1xf32> to vector<1x1x1xf32>
      %69 = vector.extract %68[0, 0, 0] : f32 from vector<1x1x1xf32>
      %cst_37 = arith.constant 1.800000e+01 : f32
      %70 = arith.divf %69, %cst_37 : f32
      %cst_38 = arith.constant 1.000000e+00 : f32
      %71 = arith.subf %cst_38, %70 : f32
      %c0_39 = arith.constant 0 : index
      %72 = memref.load %arg3[%c0_39] : memref<2xf32, #tpu.memory_space<smem>>
      memref.store %71, %arg3[%c0_39] : memref<2xf32, #tpu.memory_space<smem>>
      %c1 = arith.constant 1 : index
      %73 = memref.load %arg3[%c1] : memref<2xf32, #tpu.memory_space<smem>>
      memref.store %70, %arg3[%c1] : memref<2xf32, #tpu.memory_space<smem>>
    } else {
    }
    return
  }
  func.func @transform_0(%arg0: i32) -> (i32, i32) {
    %c0_i32 = arith.constant 0 : i32
    %c0_i32_0 = arith.constant 0 : i32
    return %c0_i32, %arg0 : i32, i32
  }
  func.func @transform_1(%arg0: i32) -> (i32, i32) {
    %c0_i32 = arith.constant 0 : i32
    %c0_i32_0 = arith.constant 0 : i32
    return %c0_i32, %arg0 : i32, i32
  }
  func.func @transform_2(%arg0: i32) -> i32 {
    %c0_i32 = arith.constant 0 : i32
    %c0_i32_0 = arith.constant 0 : i32
    return %c0_i32 : i32
  }
}

</mosaic_0001>

<bundles_post_ra>
// kernel: tpu_custom_call.1
= control target key start
LH: loop header
LB: loop body
LE: loop exit
PB: predicated region body
PF: predicated region fallthrough
CT: control target
= control target key end

     0   :  { %7 = vsyncpa [#allocation6], 0  ;;  %s602_s0 = inlined_call_operand.hbm [shape: f32[18,128], index: 0, kind: input, shape index: {}]   ;;  %s603_s1 = inlined_call_operand.hbm [shape: s32[1,128], index: 1, kind: input, shape index: {}]   ;;  %s604_s2 = inlined_call_operand.hbm [shape: f32[2], index: 2, kind: output, shape index: {}]  }
   0x1   :  { %8 = vsyncpa [#allocation9], 0 }
   0x2   :  { %9 = vsyncpa [#allocation7], 0  ;;  %s14_s11 = sshll.u32 %s602_s0, 4  ;;  %s515_s12 = smov [#allocation5]   ;;  %s15_s11 = int_to_ptr.hbm [resolvable:$true] %s14_s11 }
   0x3   :  { %s16_s13 = sshll.u32 %s515_s12, 4  ;;  %s28_s16 = sshll.u32 %s603_s1, 4  ;;  %s17_s13 = int_to_ptr.vmem [resolvable:$true] %s16_s13  ;;  %s29_s16 = int_to_ptr.hbm [resolvable:$true] %s28_s16 }
   0x4   :  { %s516_s17 = smov 128   ;;  %s517_s18 = smov 8  }
   0x5   :  { %22 = dma.hbm_to_vmem [thread:$0]  %s15_s11, 384, %s17_s13, [#allocation6], %s516_s17, %s516_s17, %s517_s18  }
   0x6   :  { %s518_s19 = smov [#allocation8]  }
   0x7   :  { %s30_s20 = sshll.u32 %s518_s19, 4  ;;  %s31_s20 = int_to_ptr.vmem [resolvable:$true] %s30_s20 }
   0x8   :  { %33 = dma.hbm_to_vmem [thread:$0]  %s29_s16, 16, %s31_s20, [#allocation9]  }
   0x9   :  { %509 = dma.done.wait [#allocation6], 384  }
   0xa   :  { %510 = vsyncadd [#allocation6], 4294966912 }
   0xb   :  { %511 = dma.done.wait [#allocation9], 16  }
   0xc   :  { %512 = vsyncadd [#allocation9], 4294967280  ;;  %v519_v0 = vmov 0.0   ;;  %vm58_vm0 = vcmask 1041408   ;;  %v55_v1 = vld [vmem:[#allocation5] sm:$0xff]  ;;  %v56_v2 = vld [vmem:[#allocation5 + $0x8] sm:$0xff]  ;;  %v105_v19 = vlaneseq }
   0xd   :  { %48 = vst [vmem:[#allocation2 + $0x8] sm:$0x3] %v519_v0  ;;  %v57_v3 = vld [vmem:[#allocation5 + $0x10] sm:$0x3]  ;;  %v60_v5 = vmax.f32 %v55_v1, %v56_v2  ;;  %v420_v23 = vld [vmem:[#allocation8] ss:$0 sm:$0xff] }
   0xe   :  { %51 = vst [vmem:[#allocation3 + $0x10] sm:$0x3] %v519_v0  ;;  %v59_v4 = vsel %vm58_vm0, %v57_v3, -inf  ;;  %v106_v22 = vshrl.u32 %v105_v19, 7  ;;  %s391_s23 = sshll.u32 %s604_s2, 4  ;;  %s521_s26 = smov [#allocation10]   ;;  %s392_s23 = int_to_ptr.hbm [resolvable:$true] %s391_s23 }
   0xf   :  { %54 = vst [vmem:[#allocation4 + $0x8] sm:$0x3] %v519_v0  ;;  %v61_v6 = vmax.f32 %v60_v5, %v59_v4 }
  0x10   :  { %vm110_vm1 = vcmp.eq.s32.totalorder %v106_v22, %v420_v23  ;;  %v108_v32 = vadd.s32 16, %v106_v22  ;;  %v107_v33 = vadd.s32 8, %v106_v22 }
  0x11   :  { %v62_v7 = vrot.slane %v61_v6, 4  ;;  %v403_v29 = vsel %vm110_vm1, 1.0, %v519_v0 }
  0x12   :  { %175 = vadd.xlane.f32.xlu2 %v403_v29  ;;  %vm112_vm2 = vcmp.eq.s32.totalorder %v108_v32, %v420_v23  ;;  %vm111_vm3 = vcmp.eq.s32.totalorder %v107_v33, %v420_v23 }
  0x13   :  { %v63_v8 = vmax.f32 %v61_v6, %v62_v7  ;;  %v405_v36 = vsel %vm112_vm2, 1.0, %v519_v0  ;;  %v404_v40 = vsel %vm111_vm3, 1.0, %v519_v0 }
  0x14   :  { %v121_v56 = vld [vmem:[#allocation2 + $0x8] sm:$0x3] }
  0x15   :  { %v64_v9 = vrot.slane %v63_v8, 2  ;;  %v133_v54 = vld [vmem:[#allocation3 + $0x10] sm:$0x3] }
  0x16   :  { %v142_v37 = vld [vmem:[#allocation4 + $0x8] sm:$0x3] }
  0x17   :  { %v65_v10 = vmax.f32 %v63_v8, %v64_v9  ;;  %v145_v39 = vadd.f32 %v405_v36, %v142_v37 }
  0x19   :  { %v66_v11 = vrot.slane %v65_v10, 1  ;;  %148 = vst [vmem:[#allocation4 + $0x8] sm:$0x3] %v145_v39 }
  0x1b   :  { %v67_v12 = vmax.f32 %v65_v10, %v66_v11 }
  0x1d   :  { %v68_v13 = vsub.f32 %v55_v1, %v67_v12  ;;  %v69_v14 = vsub.f32 %v56_v2, %v67_v12  ;;  %v70_v15 = vsub.f32 %v57_v3, %v67_v12 }
  0x1f   :  { %v71_v16 = vmul.f32 1.442695, %v68_v13  ;;  %v73_v17 = vmul.f32 1.442695, %v69_v14  ;;  %v75_v18 = vmul.f32 1.442695, %v70_v15 }
  0x20   :  { %v174_v0 = vld [vmem:[#allocation4 + $0x8] sm:$0x3] }
  0x21   :  { %421 = vpow2.f32 %v71_v16  ;;  %v179_v2 = vsel %vm58_vm0, %v174_v0, 0.0 }
  0x22   :  { %423 = vpow2.f32 %v73_v17 }
  0x23   :  { %425 = vpow2.f32 %v75_v18 }
  0x27   :  { %v422_v20 = vpop.eup %421 }
  0x28   :  { %v424_v21 = vpop.eup %423 }
  0x29   :  { %v426_v24 = vpop.eup %425  ;;  %v77_v25 = vadd.f32 %v424_v21, %v422_v20 }
  0x2a   :  { %v78_v26 = vsel %vm58_vm0, %v426_v24, 0.0 }
  0x2b   :  { %v79_v27 = vadd.f32 %v78_v26, %v77_v25 }
  0x2d   :  { %v80_v28 = vrot.slane %v79_v27, 4 }
  0x2f   :  { %v81_v30 = vadd.f32 %v80_v28, %v79_v27 }
  0x31   :  { %v82_v31 = vrot.slane %v81_v30, 2 }
  0x33   :  { %v83_v34 = vadd.f32 %v82_v31, %v81_v30 }
  0x35   :  { %v84_v35 = vrot.slane %v83_v34, 1 }
  0x37   :  { %v85_v38 = vadd.f32 %v84_v35, %v83_v34 }
  0x39   :  { %427 = vrcp.f32 %v85_v38  ;;  %v97_v43 = vand.u32 2147483648, %v85_v38  ;;  %vm91_vm4 = vweird.f32 %v85_v38  ;;  %v95_v45 = vand.u32 2147483647, %v85_v38 }
  0x3b   :  { %v98_v47 = vor.u32 1.1754944e-38, %v97_v43  ;;  %vm96_vm7 = vcmp.eq.f32.partialorder %v95_v45, 8.507059e+37 }
  0x3f   :  { %v428_v41 = vpop.eup %427 }
  0x40   :  { %v87_v42 = vmul.f32 %v428_v41, %v85_v38  ;;  %vm92_vm5 = vweird.f32 %v428_v41 }
  0x41   :  { %vm93_vm6 = vmor %vm91_vm4, %vm92_vm5 }
  0x42   :  { %v88_v44 = vsub.f32 1.0, %v87_v42 }
  0x44   :  { %v89_v46 = vmul.f32 %v428_v41, %v88_v44 }
  0x46   :  { %v90_v48 = vadd.f32 %v428_v41, %v89_v46 }
  0x48   :  { %v94_v49 = vsel %vm93_vm6, %v428_v41, %v90_v48 }
  0x49   :  { %v99_v50 = vsel %vm96_vm7, %v98_v47, %v94_v49 }
  0x4a   :  { %v101_v51 = vmul.f32 %v422_v20, %v99_v50  ;;  %v102_v52 = vmul.f32 %v424_v21, %v99_v50  ;;  %v103_v53 = vmul.f32 %v426_v24, %v99_v50 }
  0x4c   :  { %v122_v55 = vmul.f32 %v403_v29, %v101_v51  ;;  %v136_v57 = vadd.f32 %v133_v54, %v103_v53  ;;  %v123_v58 = vmul.f32 %v404_v40, %v102_v52  ;;  %v124_v59 = vmul.f32 %v405_v36, %v103_v53  ;;  %165 = vadd.xlane.f32.xlu0 %v101_v51 }
  0x4e   :  { %v127_v60 = vadd.f32 %v124_v59, %v121_v56  ;;  %155 = vadd.xlane.f32.xlu1 %v122_v55  ;;  %139 = vst [vmem:[#allocation3 + $0x10] sm:$0x3] %v136_v57 }
  0x50   :  { %130 = vst [vmem:[#allocation2 + $0x8] sm:$0x3] %v127_v60 }
  0x54   :  { %167 = vadd.xlane.f32.xlu0 %v102_v52 }
  0x55   :  { %v164_v61 = vld [vmem:[#allocation3 + $0x10] sm:$0x3] }
  0x56   :  { %157 = vadd.xlane.f32.xlu1 %v123_v58  ;;  %v169_v62 = vsel %vm58_vm0, %v164_v61, 0.0 }
  0x57   :  { %170 = vadd.xlane.f32.xlu2 %v169_v62  ;;  %v154_v63 = vld [vmem:[#allocation2 + $0x8] sm:$0x3] }
  0x58   :  { %v159_v1 = vsel %vm58_vm0, %v154_v63, 0.0 }
  0x5c   :  { %177 = vadd.xlane.f32.xlu0 %v404_v40 }
  0x5e   :  { %160 = vadd.xlane.f32.xlu1 %v159_v1 }
  0x5f   :  { %180 = vadd.xlane.f32.xlu2 %v179_v2 }
  0x85   :  { %v176_v4 = vpop.xlane.xlu2 %175 }
  0xbf   :  { %v166_v3 = vpop.xlane.xlu0 %165 }
  0xc0   :  { %v406_v5 = vadd.f32 -3.5555556, %v166_v3 }
  0xc1   :  { %v156_v6 = vpop.xlane.xlu1 %155 }
  0xc2   :  { %v185_v7 = vsub.f32 %v406_v5, %v156_v6  ;;  %v188_v8 = vsub.f32 %v176_v4, %v156_v6 }
  0xc4   :  { %v191_v9 = vadd.f32 %v185_v7, %v156_v6  ;;  %v242_v10 = vadd.f32 %v188_v8, %v156_v6 }
  0xc6   :  { %v194_v11 = vadd.f32 1e-07, %v191_v9  ;;  %v245_v12 = vadd.f32 1e-07, %v242_v10 }
  0xc7   :  { %v168_v13 = vpop.xlane.xlu0 %167 }
  0xc8   :  { %429 = vrcp.f32 %v194_v11  ;;  %v407_v15 = vadd.f32 -3.5555556, %v168_v13  ;;  %v206_v27 = vand.u32 2147483647, %v194_v11  ;;  %v208_v30 = vand.u32 2147483648, %v194_v11 }
  0xc9   :  { %431 = vrcp.f32 %v245_v12  ;;  %v548_v14 = vpop.xlane.xlu1 %157  ;;  %v259_v32 = vand.u32 2147483648, %v245_v12  ;;  %v257_v38 = vand.u32 2147483647, %v245_v12  ;;  %vm202_vm10 = vweird.f32 %v194_v11 }
  0xca   :  { %v171_v16 = vpop.xlane.xlu2 %170  ;;  %v186_v17 = vsub.f32 %v407_v15, %v548_v14  ;;  %vm207_vm12 = vcmp.eq.f32.partialorder %v206_v27, 8.507059e+37  ;;  %v209_v43 = vor.u32 1.1754944e-38, %v208_v30  ;;  %vm253_vm13 = vweird.f32 %v245_v12 }
  0xcb   :  { %v408_v28 = vadd.f32 -3.5555556, %v171_v16  ;;  %v260_v46 = vor.u32 1.1754944e-38, %v259_v32  ;;  %vm258_vm15 = vcmp.eq.f32.partialorder %v257_v38, 8.507059e+37 }
  0xcc   :  { %v192_v19 = vadd.f32 %v186_v17, %v548_v14 }
  0xce   :  { %v430_v18 = vpop.eup %429  ;;  %v552_v24 = vadd.f32 1e-07, %v192_v19 }
  0xcf   :  { %v432_v20 = vpop.eup %431  ;;  %v198_v21 = vmul.f32 %v430_v18, %v194_v11  ;;  %v178_v22 = vpop.xlane.xlu0 %177  ;;  %vm203_vm8 = vweird.f32 %v430_v18 }
  0xd0   :  { %v249_v23 = vmul.f32 %v432_v20, %v245_v12  ;;  %v189_v25 = vsub.f32 %v178_v22, %v548_v14  ;;  %433 = vrcp.f32 %v552_v24  ;;  %vm254_vm9 = vweird.f32 %v432_v20  ;;  %vm204_vm11 = vmor %vm202_vm10, %vm203_vm8 }
  0xd1   :  { %v199_v26 = vsub.f32 1.0, %v198_v21  ;;  %v555_v29 = vpop.xlane.xlu1 %160  ;;  %vm255_vm14 = vmor %vm253_vm13, %vm254_vm9  ;;  %v221_v61 = vand.u32 2147483647, %v552_v24  ;;  %v223_v1 = vand.u32 2147483648, %v552_v24  ;;  %vm217_vm1 = vweird.f32 %v552_v24 }
  0xd2   :  { %v250_v31 = vsub.f32 1.0, %v249_v23  ;;  %v243_v34 = vadd.f32 %v189_v25, %v548_v14  ;;  %v181_v35 = vpop.xlane.xlu2 %180  ;;  %v187_v36 = vsub.f32 %v408_v28, %v555_v29 }
  0xd3   :  { %v200_v33 = vmul.f32 %v430_v18, %v199_v26  ;;  %v190_v39 = vsub.f32 %v181_v35, %v555_v29  ;;  %vm580_vm3 = vcmp.eq.f32.partialorder %v221_v61, 8.507059e+37  ;;  %v224_v13 = vor.u32 1.1754944e-38, %v223_v1 }
  0xd4   :  { %v251_v37 = vmul.f32 %v432_v20, %v250_v31  ;;  %v246_v41 = vadd.f32 1e-07, %v243_v34  ;;  %v193_v42 = vadd.f32 %v187_v36, %v555_v29 }
  0xd5   :  { %v201_v40 = vadd.f32 %v430_v18, %v200_v33  ;;  %v244_v47 = vadd.f32 %v190_v39, %v555_v29 }
  0xd6   :  { %v252_v44 = vadd.f32 %v432_v20, %v251_v37  ;;  %435 = vrcp.f32 %v246_v41  ;;  %v434_v48 = vpop.eup %433  ;;  %v196_v51 = vadd.f32 1e-07, %v193_v42  ;;  %v274_v2 = vand.u32 2147483648, %v246_v41 }
  0xd7   :  { %v205_v45 = vsel %vm204_vm11, %v430_v18, %v201_v40  ;;  %v213_v54 = vmul.f32 %v434_v48, %v552_v24  ;;  %v247_v57 = vadd.f32 1e-07, %v244_v47  ;;  %vm218_vm0 = vweird.f32 %v434_v48 }
  0xd8   :  { %v210_v49 = vsel %vm207_vm12, %v209_v43, %v205_v45  ;;  %v256_v50 = vsel %vm255_vm14, %v432_v20, %v252_v44  ;;  %437 = vrcp.f32 %v196_v51  ;;  %vm576_vm2 = vmor %vm217_vm1, %vm218_vm0  ;;  %v272_v7 = vand.u32 2147483647, %v246_v41 }
  0xd9   :  { %v563_v52 = vmul.f32 %v210_v49, %v156_v6  ;;  %v261_v53 = vsel %vm258_vm15, %v260_v46, %v256_v50  ;;  %v214_v56 = vsub.f32 1.0, %v213_v54  ;;  %439 = vrcp.f32 %v247_v57 }
  0xda   :  { %v566_v55 = vmul.f32 %v261_v53, %v156_v6  ;;  %v238_v11 = vand.u32 2147483648, %v196_v51  ;;  %vm268_vm5 = vweird.f32 %v246_v41  ;;  %v275_v15 = vor.u32 1.1754944e-38, %v274_v2 }
  0xdb   :  { %v215_v60 = vmul.f32 %v434_v48, %v214_v56  ;;  %vm232_vm6 = vweird.f32 %v196_v51  ;;  %v236_v17 = vand.u32 2147483647, %v196_v51  ;;  %vm273_vm9 = vcmp.eq.f32.partialorder %v272_v7, 8.507059e+37 }
  0xdc   :  { %v299_v58 = vadd.f32 %v566_v55, %v563_v52  ;;  %v436_v59 = vpop.eup %435  ;;  %v239_v23 = vor.u32 1.1754944e-38, %v238_v11  ;;  %v287_v25 = vand.u32 2147483647, %v247_v57  ;;  %v289_v28 = vand.u32 2147483648, %v247_v57 }
  0xdd   :  { %v264_v63 = vmul.f32 %v436_v59, %v246_v41  ;;  %v216_v0 = vadd.f32 %v434_v48, %v215_v60  ;;  %vm269_vm4 = vweird.f32 %v436_v59  ;;  %vm237_vm12 = vcmp.eq.f32.partialorder %v236_v17, 8.507059e+37 }
  0xde   :  { %v571_v62 = vadd.f32 1e-07, %v299_v58  ;;  %v438_v3 = vpop.eup %437  ;;  %vm270_vm7 = vmor %vm268_vm5, %vm269_vm4  ;;  %vm283_vm13 = vweird.f32 %v247_v57  ;;  %vm288_vm15 = vcmp.eq.f32.partialorder %v287_v25, 8.507059e+37  ;;  %v290_v40 = vor.u32 1.1754944e-38, %v289_v28 }
  0xdf   :  { %v265_v4 = vsub.f32 1.0, %v264_v63  ;;  %v228_v8 = vmul.f32 %v438_v3, %v196_v51  ;;  %v220_v9 = vsel %vm576_vm2, %v434_v48, %v216_v0  ;;  %v440_v12 = vpop.eup %439  ;;  %vm233_vm8 = vweird.f32 %v438_v3 }
  0xe0   :  { %441 = vrcp.f32 %v571_v62  ;;  %v279_v18 = vmul.f32 %v440_v12, %v247_v57  ;;  %v225_v20 = vsel %vm580_vm3, %v224_v13, %v220_v9  ;;  %vm234_vm10 = vmor %vm232_vm6, %vm233_vm8  ;;  %vm284_vm11 = vweird.f32 %v440_v12 }
  0xe1   :  { %v266_v10 = vmul.f32 %v436_v59, %v265_v4  ;;  %v229_v16 = vsub.f32 1.0, %v228_v8  ;;  %v226_v32 = vmul.f32 %v225_v20, %v548_v14  ;;  %vm285_vm14 = vmor %vm283_vm13, %vm284_vm11  ;;  %v316_v48 = vand.u32 2147483648, %v571_v62 }
  0xe2   :  { %v280_v24 = vsub.f32 1.0, %v279_v18  ;;  %vm310_vm1 = vweird.f32 %v571_v62  ;;  %v314_v50 = vand.u32 2147483647, %v571_v62  ;;  %v293_v53 = vmul.f32 %v566_v55, %v563_v52 }
  0xe3   :  { %v267_v19 = vadd.f32 %v436_v59, %v266_v10  ;;  %v230_v21 = vmul.f32 %v438_v3, %v229_v16  ;;  %v317_v56 = vor.u32 1.1754944e-38, %v316_v48  ;;  %vm360_vm13 = vcmask 1024  }
  0xe4   :  { %v281_v33 = vmul.f32 %v440_v12, %v280_v24  ;;  %vm315_vm3 = vcmp.eq.f32.partialorder %v314_v50, 8.507059e+37 }
  0xe5   :  { %v271_v26 = vsel %vm270_vm7, %v436_v59, %v267_v19  ;;  %v231_v27 = vadd.f32 %v438_v3, %v230_v21  ;;  %v296_v59 = vmul.f32 2.0, %v293_v53 }
  0xe6   :  { %v442_v22 = vpop.eup %441  ;;  %v276_v30 = vsel %vm273_vm9, %v275_v15, %v271_v26  ;;  %v282_v38 = vadd.f32 %v440_v12, %v281_v33 }
  0xe7   :  { %v306_v31 = vmul.f32 %v442_v22, %v571_v62  ;;  %v277_v34 = vmul.f32 %v276_v30, %v548_v14  ;;  %v235_v35 = vsel %vm234_vm10, %v438_v3, %v231_v27  ;;  %vm311_vm0 = vweird.f32 %v442_v22 }
  0xe8   :  { %v240_v37 = vsel %vm237_vm12, %v239_v23, %v235_v35  ;;  %v286_v42 = vsel %vm285_vm14, %v440_v12, %v282_v38  ;;  %vm312_vm2 = vmor %vm310_vm1, %vm311_vm0  ;;  %vm356_vm12 = vcmask 7168  }
  0xe9   :  { %v307_v36 = vsub.f32 1.0, %v306_v31  ;;  %v300_v39 = vadd.f32 %v277_v34, %v226_v32  ;;  %v241_v41 = vmul.f32 %v240_v37, %v555_v29  ;;  %v291_v45 = vsel %vm288_vm15, %v290_v40, %v286_v42 }
  0xea   :  { %v292_v46 = vmul.f32 %v291_v45, %v555_v29  ;;  %v294_v61 = vmul.f32 %v277_v34, %v226_v32  ;;  %v520_v31 = vmov 18.0  }
  0xeb   :  { %v303_v43 = vadd.f32 1e-07, %v300_v39  ;;  %v308_v44 = vmul.f32 %v442_v22, %v307_v36 }
  0xec   :  { %v301_v14 = vadd.f32 %v292_v46, %v241_v41  ;;  %v297_v52 = vmul.f32 2.0, %v294_v61  ;;  %v295_v6 = vmul.f32 %v292_v46, %v241_v41 }
  0xed   :  { %443 = vrcp.f32 %v303_v43  ;;  %v309_v47 = vadd.f32 %v442_v22, %v308_v44  ;;  %v331_v60 = vand.u32 2147483648, %v303_v43  ;;  %v329_v0 = vand.u32 2147483647, %v303_v43 }
  0xee   :  { %v304_v49 = vadd.f32 1e-07, %v301_v14  ;;  %vm325_vm5 = vweird.f32 %v303_v43  ;;  %v298_v16 = vmul.f32 2.0, %v295_v6 }
  0xef   :  { %v313_v54 = vsel %vm312_vm2, %v442_v22, %v309_v47  ;;  %v332_v4 = vor.u32 1.1754944e-38, %v331_v60  ;;  %vm330_vm7 = vcmp.eq.f32.partialorder %v329_v0, 8.507059e+37 }
  0xf0   :  { %445 = vrcp.f32 %v304_v49  ;;  %v318_v57 = vsel %vm315_vm3, %v317_v56, %v313_v54  ;;  %v346_v8 = vand.u32 2147483648, %v304_v49  ;;  %v344_v12 = vand.u32 2147483647, %v304_v49 }
  0xf1   :  { %v319_v62 = vmul.f32 %v318_v57, %v296_v59  ;;  %vm340_vm9 = vweird.f32 %v304_v49  ;;  %447 = vrcp.f32 %v520_v31 }
  0xf2   :  { %v347_v17 = vor.u32 1.1754944e-38, %v346_v8  ;;  %vm345_vm11 = vcmp.eq.f32.partialorder %v344_v12, 8.507059e+37 }
  0xf3   :  { %v444_v51 = vpop.eup %443  ;;  %v350_v9 = vmax.f32 %v319_v62, 1e-07 }
  0xf4   :  { %v321_v29 = vmul.f32 %v444_v51, %v303_v43  ;;  %vm326_vm4 = vweird.f32 %v444_v51 }
  0xf5   :  { %vm327_vm6 = vmor %vm325_vm5, %vm326_vm4  ;;  %v353_v19 = vmin.f32 %v350_v9, 0.9999999 }
  0xf6   :  { %v322_v58 = vsub.f32 1.0, %v321_v29  ;;  %v446_v1 = vpop.eup %445 }
  0xf7   :  { %v336_v3 = vmul.f32 %v446_v1, %v304_v49  ;;  %vm341_vm8 = vweird.f32 %v446_v1  ;;  %v357_v25 = vsel %vm356_vm12, %v353_v19, 0.0  ;;  %v448_v32 = vpop.eup %447 }
  0xf8   :  { %v323_v63 = vmul.f32 %v444_v51, %v322_v58  ;;  %vm342_vm10 = vmor %vm340_vm9, %vm341_vm8  ;;  %v373_v33 = vmul.f32 18.0, %v448_v32  ;;  %vm377_vm14 = vweird.f32 %v448_v32 }
  0xf9   :  { %v337_v5 = vsub.f32 1.0, %v336_v3 }
  0xfa   :  { %v324_v2 = vadd.f32 %v444_v51, %v323_v63  ;;  %v374_v34 = vsub.f32 1.0, %v373_v33 }
  0xfb   :  { %v338_v11 = vmul.f32 %v446_v1, %v337_v5 }
  0xfc   :  { %v328_v55 = vsel %vm327_vm6, %v444_v51, %v324_v2  ;;  %v375_v38 = vmul.f32 %v448_v32, %v374_v34 }
  0xfd   :  { %v333_v7 = vsel %vm330_vm7, %v332_v4, %v328_v55  ;;  %v339_v13 = vadd.f32 %v446_v1, %v338_v11 }
  0xfe   :  { %v334_v10 = vmul.f32 %v333_v7, %v297_v52  ;;  %v376_v41 = vadd.f32 %v448_v32, %v375_v38 }
  0xff   :  { %v343_v18 = vsel %vm342_vm10, %v446_v1, %v339_v13 }
 0x100   :  { %v351_v15 = vmax.f32 %v334_v10, 1e-07  ;;  %v348_v21 = vsel %vm345_vm11, %v347_v17, %v343_v18  ;;  %v378_v44 = vsel %vm377_vm14, %v448_v32, %v376_v41 }
 0x101   :  { %v349_v22 = vmul.f32 %v348_v21, %v298_v16 }
 0x102   :  { %v354_v20 = vmin.f32 %v351_v15, 0.9999999 }
 0x103   :  { %v352_v24 = vmax.f32 %v349_v22, 1e-07 }
 0x104   :  { %v358_v23 = vsel %vm356_vm12, %v354_v20, 0.0 }
 0x105   :  { %v359_v26 = vadd.f32 %v358_v23, %v357_v25  ;;  %v355_v27 = vmin.f32 %v352_v24, 0.9999999 }
 0x107   :  { %v361_v28 = vsel %vm360_vm13, %v355_v27, 0.0 }
 0x108   :  { %v362_v30 = vadd.f32 %v361_v28, %v359_v26 }
 0x10a   :  { %363 = vadd.xlane.f32.xlu0 %v362_v30 }
 0x17d   :  { %v364_v35 = vpop.xlane.xlu0 %363 }
 0x17e   :  { %v365_v36 = vrot.slane %v364_v35, 4 }
 0x180   :  { %v366_v37 = vadd.f32 %v365_v36, %v364_v35 }
 0x182   :  { %v367_v39 = vrot.slane %v366_v37, 2 }
 0x184   :  { %v368_v40 = vadd.f32 %v367_v39, %v366_v37 }
 0x186   :  { %v369_v42 = vrot.slane %v368_v40, 1 }
 0x188   :  { %v370_v43 = vadd.f32 %v369_v42, %v368_v40 }
 0x18a   :  { %409 = vpush %v370_v43 }
 0x18b   :  { %411 = vpush %v378_v44 }
 0x1bb   :  { %s410_s0 = spop %409 }
 0x1bc   :  { %s412_s1 = spop %411 }
 0x1bd   :  { %s380_s24 = smul.f32 %s412_s1, %s410_s0 }
 0x1bf   :  { %s381_s25 = ssub.f32 1.0, %s380_s24 }
 0x1c0   :  { %385 = sst [smem:[#allocation10 + $0x1]] %s380_s24 }
 0x1c1   :  { %383 = sst [smem:[#allocation10]] %s381_s25 }
 0x1c2   :  { %394 = dma.smem_to_hbm %s521_s26, 16, %s392_s23, [#allocation7]  }
 0x1c3   :  { %513 = dma.done.wait [#allocation7], 16  }
 0x1c4   :  { %514 = vsyncadd [#allocation7], 4294967280 }
 0x1c5   :  { %399 = sfence }
 0x1c6   :  { %400 = vsyncpa [#allocation6], 1 }
 0x1c7   :  { %401 = vsyncpa [#allocation9], 1 }
 0x1c8   :  { %402 = vsyncpa [#allocation7], 1 }

</bundles_post_ra>
